<compile_context>
chip_gen: v5e
topology: v5e:2x2
jax: 0.10.0
libtpu: 0.0.40
codegen_flags: <defaults>
</compile_context>

<pallas_src>
import functools
import math

import jax
import jax.numpy as jnp
from jax import lax
from jax.experimental import pallas as pl
from jax.experimental.pallas import tpu as pltpu


def _round_up(a, b):
    return ((a + b - 1) // b) * b


def _round_down(a, b):
    return (a // b) * b


def _sublane_multiple(dtype):
    # Sub-32-bit dtypes pack along sublanes: native row-tile multiple.
    itemsize = jnp.dtype(dtype).itemsize
    return {4: 8, 2: 16, 1: 32}.get(itemsize, 8)


# ----------------------------------------------------------------------------
# Path A: full (padded) last dim per block, rows tiled.
#   Zero only the pad columns, store the data columns exactly once.
#   Negative pads => static crop of the input ref view (no extra HBM traffic).
# ----------------------------------------------------------------------------
def _pad_full_width_kernel(x_ref, o_ref, *, pad_left, pad_right):
    L = x_ref.shape[-1]
    crop_l = max(0, -pad_left)
    crop_r = max(0, -pad_right)
    zl = max(0, pad_left)
    zr = max(0, pad_right)
    Lc = L - crop_l - crop_r                       # columns actually copied
    rows = o_ref.shape[0]
    if zl > 0:
        o_ref[:, :zl] = jnp.zeros((rows, zl), dtype=o_ref.dtype)
    if zr > 0:
        o_ref[:, zl + Lc:] = jnp.zeros((rows, zr), dtype=o_ref.dtype)
    o_ref[:, zl:zl + Lc] = x_ref[:, crop_l:crop_l + Lc]


# ----------------------------------------------------------------------------
# Path B: output columns tiled in 128-multiples (long sequences).
#   Output block j needs input columns [j*TC - pad_left, (j+1)*TC - pad_left);
#   with q, r = divmod(pad_left, TC) that window spans input blocks (j-q-1)
#   and (j-q).  Both are fetched (block indices clamped into range), shifted
#   into place with static slices + concat, and an iota mask zeroes every
#   column whose source index falls outside [0, L).
# ----------------------------------------------------------------------------
def _pad_col_tiled_kernel(*refs, pad_left, L, TC):
    r = pad_left % TC
    if r == 0:
        x_cur_ref, o_ref = refs
        data = x_cur_ref[...]
    else:
        x_prev_ref, x_cur_ref, o_ref = refs
        data = jnp.concatenate(
            [x_prev_ref[:, TC - r:], x_cur_ref[:, :TC - r]], axis=-1)
    j = pl.program_id(1)
    base = j * TC - pad_left                        # source col of output col 0
    col = lax.broadcasted_iota(jnp.int32, o_ref.shape, 1) + base
    valid = (col >= 0) & (col < L)
    o_ref[...] = jnp.where(valid, data, jnp.zeros_like(data))


def zero_pad1d(x, pad_left, pad_right, *, vmem_budget_bytes=12 << 20,
               col_tile=1024):
    """Equivalent of torch.nn.functional.pad(x, (pad_left, pad_right))."""
    pad_left = int(pad_left)
    pad_right = int(pad_right)
    if pad_left == 0 and pad_right == 0:
        return x

    orig_shape = x.shape
    lead = orig_shape[:-1]
    L = orig_shape[-1]
    L_out = L + pad_left + pad_right
    if L_out <= 0:
        return jnp.zeros(lead + (max(L_out, 0),), dtype=x.dtype)
    # Columns surviving any negative-pad crop.
    Lc = L - max(0, -pad_left) - max(0, -pad_right)
    if Lc <= 0:
        return jnp.zeros(lead + (L_out,), dtype=x.dtype)

    R = math.prod(lead) if lead else 1
    x2 = x.reshape(R, L)
    itemsize = jnp.dtype(x.dtype).itemsize
    sub = _sublane_multiple(x.dtype)

    # Minimum (one sublane-multiple of rows) working set for full-width blocks,
    # double-buffered input + output.
    min_full_ws = 2 * (L + L_out) * sub * itemsize
    use_full_width = (min_full_ws <= vmem_budget_bytes) or L < 128 or L_out < 128

    if use_full_width:
        # ---------------- Path A ----------------
        if R <= sub:
            tr = R                                   # block == full row extent
        else:
            bytes_per_row = 2 * (L + L_out) * itemsize
            cap_vmem = max(sub, _round_down(
                vmem_budget_bytes // max(bytes_per_row, 1), sub))
            cap_steps = max(sub, _round_up(-(-R // 8), sub))  # >= ~8 grid steps
            tr = max(sub, min(cap_vmem, cap_steps, _round_down(R, sub)))

        out2 = pl.pallas_call(
            functools.partial(_pad_full_width_kernel,
                              pad_left=pad_left, pad_right=pad_right),
            out_shape=jax.ShapeDtypeStruct((R, L_out), x.dtype),
            grid=(pl.cdiv(R, tr),),
            in_specs=[pl.BlockSpec((tr, L), lambda i: (i, 0))],
            out_specs=pl.BlockSpec((tr, L_out), lambda i: (i, 0)),
            compiler_params=pltpu.CompilerParams(
                dimension_semantics=("parallel",)),
        )(x2)
    else:
        # ---------------- Path B ----------------
        TC = min(col_tile, _round_down(L, 128), _round_down(L_out, 128))
        TC = max(TC, 128)
        nin = pl.cdiv(L, TC)                         # number of input col blocks
        q, r = divmod(pad_left, TC)                  # works for negative pads too
        n_in_specs = 1 if r == 0 else 2

        bytes_per_row = 2 * (n_in_specs + 1) * TC * itemsize
        if R <= sub:
            tr = R
        else:
            cap_vmem = max(sub, _round_down(
                vmem_budget_bytes // max(bytes_per_row, 1), sub))
            tr = max(sub, min(cap_vmem, _round_down(R, sub)))

        cur_spec = pl.BlockSpec(
            (tr, TC), lambda i, j: (i, jnp.clip(j - q, 0, nin - 1)))
        if r == 0:
            in_specs = [cur_spec]
            operands = (x2,)
        else:
            prev_spec = pl.BlockSpec(
                (tr, TC), lambda i, j: (i, jnp.clip(j - q - 1, 0, nin - 1)))
            in_specs = [prev_spec, cur_spec]
            operands = (x2, x2)

        out2 = pl.pallas_call(
            functools.partial(_pad_col_tiled_kernel,
                              pad_left=pad_left, L=L, TC=TC),
            out_shape=jax.ShapeDtypeStruct((R, L_out), x.dtype),
            grid=(pl.cdiv(R, tr), pl.cdiv(L_out, TC)),
            in_specs=in_specs,
            out_specs=pl.BlockSpec((tr, TC), lambda i, j: (i, j)),
            compiler_params=pltpu.CompilerParams(
                dimension_semantics=("parallel", "parallel")),
        )(*operands)

    return out2.reshape(lead + (L_out,))


class ZeroPad1d:
    """Mirror of the PyTorch module."""

    def __init__(self, pad_left, pad_right):
        self.pad_left = pad_left
        self.pad_right = pad_right

    def __call__(self, x):
        return zero_pad1d(x, self.pad_left, self.pad_right)


if __name__ == "__main__":
    key = jax.random.PRNGKey(0)
    k1, k2, k3 = jax.random.split(key, 3)

    # Small case consistent with the module: [B, C, L] = [2, 4, 16], pads (3, 5).
    B, C, L = 2, 4, 16
    x = jax.random.normal(k1, (B, C, L), dtype=jnp.float32)
    pad = ZeroPad1d(3, 5)
    y = jax.block_until_ready(pad(x))
    ref = jnp.pad(x, ((0, 0), (0, 0), (3, 5)))
    assert y.shape == ref.shape, y.shape
    assert bool(jnp.array_equal(y, ref)), "mismatch (positive pads)"

    # Negative pads (F.pad crop semantics), handled in-kernel (no wrapper copy).
    y_neg = jax.block_until_ready(zero_pad1d(x, -3, 2))
    ref_neg = jnp.pad(x[..., 3:], ((0, 0), (0, 0), (0, 2)))
    assert y_neg.shape == ref_neg.shape, y_neg.shape
    assert bool(jnp.array_equal(y_neg, ref_neg)), "mismatch (negative pad crop)"

    # Column-tiled halo path, forced by a tiny VMEM budget.
    x_b = jax.random.normal(k2, (2, 8, 640), dtype=jnp.float32)
    y_b = jax.block_until_ready(
        zero_pad1d(x_b, 3, 5, vmem_budget_bytes=64 << 10, col_tile=256))
    ref_b = jnp.pad(x_b, ((0, 0), (0, 0), (3, 5)))
    assert y_b.shape == ref_b.shape, y_b.shape
    assert bool(jnp.array_equal(y_b, ref_b)), "mismatch (column-tiled path)"

    # bf16 exercises the dtype-aware (16-row) sublane tiling.
    x_bf = jax.random.normal(k3, (4, 8, 64), dtype=jnp.bfloat16)
    y_bf = jax.block_until_ready(zero_pad1d(x_bf, 1, 1))
    ref_bf = jnp.pad(x_bf, ((0, 0), (0, 0), (1, 1)))
    assert y_bf.shape == ref_bf.shape, y_bf.shape
    assert bool(jnp.array_equal(y_bf, ref_bf)), "mismatch (bf16)"

    print("KERNEL_OK")
</pallas_src>

<mosaic_0001>
module attributes {stable_mosaic.version = 11 : i64} {
  func.func @_pad_full_width_kernel(%arg0: i32, %arg1: memref<8x16xf32, #tpu.memory_space<vmem>>, %arg2: memref<8x24xf32, #tpu.memory_space<vmem>>) attributes {dimension_semantics = [#tpu.dimension_semantics<parallel>], iteration_bounds = array<i64: 1>, scalar_prefetch = 0 : i64, scratch_operands = 0 : i64, tpu.core_type = #tpu.core_type<tc>, window_params = [{transform_indices = @transform_0, window_bounds = array<i64: 8, 16>}, {transform_indices = @transform_1, window_bounds = array<i64: 8, 24>}]} {
    %cst = arith.constant 0.000000e+00 : f32
    %0 = vector.broadcast %cst : f32 to vector<8x3xf32>
    %c0 = arith.constant 0 : index
    %c0_0 = arith.constant 0 : index
    %1 = vector.load %arg2[%c0, %c0_0] : memref<8x24xf32, #tpu.memory_space<vmem>>, vector<8x3xf32>
    tpu.vector_store %arg2[%c0, %c0_0], %0 {strides = array<i32>} : memref<8x24xf32, #tpu.memory_space<vmem>>, vector<8x3xf32>,
    %cst_1 = arith.constant 0.000000e+00 : f32
    %2 = vector.broadcast %cst_1 : f32 to vector<8x5xf32>
    %c0_2 = arith.constant 0 : index
    %c19 = arith.constant 19 : index
    %3 = vector.load %arg2[%c0_2, %c19] : memref<8x24xf32, #tpu.memory_space<vmem>>, vector<8x5xf32>
    tpu.vector_store %arg2[%c0_2, %c19], %2 {strides = array<i32>} : memref<8x24xf32, #tpu.memory_space<vmem>>, vector<8x5xf32>,
    %c0_3 = arith.constant 0 : index
    %c0_4 = arith.constant 0 : index
    %4 = vector.load %arg1[%c0_3, %c0_4] : memref<8x16xf32, #tpu.memory_space<vmem>>, vector<8x16xf32>
    %c0_5 = arith.constant 0 : index
    %c3 = arith.constant 3 : index
    %5 = vector.load %arg2[%c0_5, %c3] : memref<8x24xf32, #tpu.memory_space<vmem>>, vector<8x16xf32>
    tpu.vector_store %arg2[%c0_5, %c3], %4 {strides = array<i32>} : memref<8x24xf32, #tpu.memory_space<vmem>>, vector<8x16xf32>,
    return
  }
  func.func @transform_0(%arg0: i32) -> (i32, i32) {
    %c0_i32 = arith.constant 0 : i32
    %c0_i32_0 = arith.constant 0 : i32
    return %arg0, %c0_i32 : i32, i32
  }
  func.func @transform_1(%arg0: i32) -> (i32, i32) {
    %c0_i32 = arith.constant 0 : i32
    %c0_i32_0 = arith.constant 0 : i32
    return %arg0, %c0_i32 : i32, i32
  }
}

</mosaic_0001>

<bundles_post_ra>
// kernel: tpu_custom_call.1
= control target key start
LH: loop header
LB: loop body
LE: loop exit
PB: predicated region body
PF: predicated region fallthrough
CT: control target
= control target key end

     0   :  { %6 = vsyncpa [#allocation3], 0  ;;  %s127_s0 = inlined_call_operand.hbm [shape: f32[8,16], index: 0, kind: input, shape index: {}]   ;;  %s128_s1 = inlined_call_operand.hbm [shape: f32[8,24], index: 1, kind: output, shape index: {}]  }
   0x1   :  { %7 = vsyncpa [#allocation4], 0  ;;  %s13_s8 = sshll.u32 %s127_s0, 4  ;;  %s107_s9 = smov [#allocation2]   ;;  %s14_s8 = int_to_ptr.hbm [resolvable:$true] %s13_s8 }
   0x2   :  { %s15_s10 = sshll.u32 %s107_s9, 4  ;;  %s16_s10 = int_to_ptr.vmem [resolvable:$true] %s15_s10 }
   0x3   :  { %18 = dma.hbm_to_vmem [thread:$0]  %s14_s8, 128, %s16_s10, [#allocation3]  }
   0x4   :  { %103 = dma.done.wait [#allocation3], 128  }
   0x5   :  { %104 = vsyncadd [#allocation3], 4294967168  ;;  %vm23_vm0 = vcmask 23552   ;;  %vm25_vm1 = vcmask 195736   ;;  %v108_v0 = vmov 0.0   ;;  %v27_v1 = vld [vmem:[#allocation2] sm:$0xff] }
   0x6   :  { %24 = vst.msk [vmem:[#allocation5] sm:$0xff] %vm23_vm0, %v108_v0  ;;  %s109_s11 = smov 3   ;;  %s110_s12 = smov [#allocation5]   ;;  %vm32_vm2 = vcmask 154648  }
   0x7   :  { %26 = vst.msk [vmem:[#allocation5] sm:$0xff] %vm25_vm1, %v108_v0  ;;  %29 = vrot.lane.b32.xlu0 %v27_v1, %s109_s11  ;;  %s39_s13 = sshll.u32 %s110_s12, 4  ;;  %s41_s0 = sshll.u32 %s128_s1, 4  ;;  %s40_s13 = int_to_ptr.vmem [resolvable:$true] %s39_s13  ;;  %s42_s0 = int_to_ptr.hbm [resolvable:$true] %s41_s0 }
  0x79   :  { %v30_v2 = vpop.permute.xlu0 %29 }
  0x7a   :  { %33 = vst.msk [vmem:[#allocation5] sm:$0xff] %vm32_vm2, %v30_v2 }
  0x7b   :  { %44 = dma.vmem_to_hbm [thread:$0]  %s40_s13, 128, %s42_s0, [#allocation4]  }
  0x7c   :  { %105 = dma.done.wait [#allocation4], 128  }
  0x7d   :  { %106 = vsyncadd [#allocation4], 4294967168 }
  0x7e   :  { %49 = vsyncpa [#allocation3], 1 }
  0x7f   :  { %50 = vsyncpa [#allocation4], 1 }

</bundles_post_ra>
